<compile_context>
chip_gen: v7x
topology: tpu7x:2x2x1
jax: 0.10.0
libtpu: 0.0.40
codegen_flags: <defaults>
</compile_context>

<pallas_src>
import jax
import jax.numpy as jnp
from jax.experimental import pallas as pl
from jax.experimental.pallas import tpu as pltpu


def fusion_kernel(sem_ref, exp_ref, w_ref, b_ref, out_ref):
    """One batch tile:  out = x_sem @ W[:Ds] + x_exp @ W[Ds:] + b  (f32 acc)."""
    ds = sem_ref.shape[-1]  # static
    acc = jnp.dot(sem_ref[...], w_ref[:ds, :], preferred_element_type=jnp.float32)
    acc = acc + jnp.dot(exp_ref[...], w_ref[ds:, :], preferred_element_type=jnp.float32)
    out_ref[...] = (acc + b_ref[...]).astype(out_ref.dtype)


def _pick_batch_tile(batch, *, max_tile=512, min_grid=2):
    """Largest multiple-of-16 tile dividing `batch` with >= min_grid steps.

    min_grid=2 keeps both v7x TensorCores busy on the "parallel" batch axis;
    on single-TC v5e/v6e, raise max_tile / set min_grid=1 for fewer grid steps.
    Falls back to a padded tail block (handled by Pallas) if no divisor exists.
    """
    if batch <= 16:
        return 16
    best = None
    t = 16
    limit = min(batch, max_tile)
    while t <= limit:
        if batch % t == 0 and batch // t >= min_grid:
            best = t
        t += 16
    if best is not None:
        return best
    # No exact divisor: use a 16-multiple tile; Pallas pads/masks the tail block.
    return min(max_tile, ((batch + 15) // 16) * 16)


def fusion_forward(semantic_emb, expressive_emb, w_sem, b_sem, w_exp, b_exp, alpha,
                   *, max_batch_tile=512, min_grid=2, out_dtype=jnp.bfloat16):
    """FusionModule forward.

    semantic_emb:   [B, Ds]   (cast to bf16 for the kernel)
    expressive_emb: [B, De]   (cast to bf16 for the kernel)
    w_sem: [Ds, Dc], w_exp: [De, Dc]   (pre-transposed vs. nn.Linear)
    b_sem: [Dc],     b_exp: [De -> Dc]
    alpha: scalar (learned)

    alpha is folded into the packed weights / combined bias here, per call
    (it is a learned parameter, so the fold must be regenerated each step —
    ~100 KB of wrapper traffic, negligible vs. the activation bytes saved).
    """
    B, Ds = semantic_emb.shape
    _, De = expressive_emb.shape
    Dc = w_sem.shape[1]
    K = Ds + De

    a = jnp.asarray(alpha, jnp.float32)
    # alpha-folded packed weight slab [Ds+De, Dc] in bf16 (one HBM slab, VMEM
    # resident across grid steps) and a single combined f32 bias [1, Dc].
    w_cat = jnp.concatenate(
        [a * w_sem.astype(jnp.float32), (1.0 - a) * w_exp.astype(jnp.float32)],
        axis=0,
    ).astype(jnp.bfloat16)
    b_comb = (a * b_sem.astype(jnp.float32)
              + (1.0 - a) * b_exp.astype(jnp.float32)).reshape(1, Dc)

    x_sem = semantic_emb.astype(jnp.bfloat16)
    x_exp = expressive_emb.astype(jnp.bfloat16)

    TB = _pick_batch_tile(B, max_tile=max_batch_tile, min_grid=min_grid)
    grid = (pl.cdiv(B, TB),)

    out_itemsize = jnp.dtype(out_dtype).itemsize
    cost = pl.CostEstimate(
        flops=2 * B * K * Dc,
        transcendentals=0,
        bytes_accessed=(K * Dc * 2          # bf16 packed weights
                        + B * K * 2         # bf16 activations
                        + Dc * 4            # combined f32 bias
                        + B * Dc * out_itemsize),
    )

    out = pl.pallas_call(
        fusion_kernel,
        out_shape=jax.ShapeDtypeStruct((B, Dc), out_dtype),
        grid_spec=pltpu.PrefetchScalarGridSpec(
            num_scalar_prefetch=0,
            grid=grid,
            in_specs=[
                pl.BlockSpec((TB, Ds), lambda i: (i, 0)),   # semantic tile (bf16)
                pl.BlockSpec((TB, De), lambda i: (i, 0)),   # expressive tile (bf16)
                pl.BlockSpec((K, Dc), lambda i: (0, 0)),    # packed weights (resident)
                pl.BlockSpec((1, Dc), lambda i: (0, 0)),    # combined bias (resident)
            ],
            out_specs=pl.BlockSpec((TB, Dc), lambda i: (i, 0)),
        ),
        compiler_params=pltpu.CompilerParams(
            dimension_semantics=("parallel",),   # batch tiles independent (v7x: 2 TCs)
            vmem_limit_bytes=32 * 1024 * 1024,   # modest; footprint is far smaller
        ),
        cost_estimate=cost,
    )(x_sem, x_exp, w_cat, b_comb)

    return out


if __name__ == "__main__":
    # Small shapes consistent with the module (a batch of embedding vectors),
    # lane-aligned (multiples of 128) and with B giving a 2-step parallel grid.
    B = 256
    SEMANTIC_DIM = 256
    EXPRESSIVE_DIM = 128
    COMMON_DIM = 128

    key = jax.random.PRNGKey(0)
    k1, k2, k3, k4, k5, k6 = jax.random.split(key, 6)

    # Synthetic parameters mimicking nn.Linear, stored pre-transposed [in, out].
    w_sem = jax.random.normal(k1, (SEMANTIC_DIM, COMMON_DIM), jnp.float32) * 0.02
    b_sem = jax.random.normal(k2, (COMMON_DIM,), jnp.float32) * 0.02
    w_exp = jax.random.normal(k3, (EXPRESSIVE_DIM, COMMON_DIM), jnp.float32) * 0.02
    b_exp = jax.random.normal(k4, (COMMON_DIM,), jnp.float32) * 0.02
    alpha = jnp.float32(0.5)

    # Activations are produced directly in bf16 (no f32 read + in-kernel cast).
    semantic_emb = jax.random.normal(k5, (B, SEMANTIC_DIM), jnp.float32).astype(jnp.bfloat16)
    expressive_emb = jax.random.normal(k6, (B, EXPRESSIVE_DIM), jnp.float32).astype(jnp.bfloat16)

    out = fusion_forward(semantic_emb, expressive_emb,
                         w_sem, b_sem, w_exp, b_exp, alpha)
    out = jax.block_until_ready(out)

    # Reference (module semantics in f32, applied to the same bf16 inputs).
    xs = semantic_emb.astype(jnp.float32)
    xe = expressive_emb.astype(jnp.float32)
    ref = alpha * (xs @ w_sem + b_sem) + (1.0 - alpha) * (xe @ w_exp + b_exp)

    assert out.shape == (B, COMMON_DIM)
    assert out.dtype == jnp.bfloat16
    err = float(jnp.max(jnp.abs(out.astype(jnp.float32) - ref)))
    assert jnp.allclose(out.astype(jnp.float32), ref, atol=2e-2, rtol=2e-2), err

    print("KERNEL_OK")
</pallas_src>

<mosaic_0001>
module attributes {stable_mosaic.version = 11 : i64} {
  func.func @fusion_kernel(%arg0: i32, %arg1: memref<128x256xbf16, #tpu.memory_space<vmem>>, %arg2: memref<128x128xbf16, #tpu.memory_space<vmem>>, %arg3: memref<384x128xbf16, #tpu.memory_space<vmem>>, %arg4: memref<1x128xf32, #tpu.memory_space<vmem>>, %arg5: memref<128x128xbf16, #tpu.memory_space<vmem>>) attributes {dimension_semantics = [#tpu.dimension_semantics<parallel>], iteration_bounds = array<i64: 2>, scalar_prefetch = 0 : i64, scratch_operands = 0 : i64, tpu.core_type = #tpu.core_type<tc>, window_params = [{transform_indices = @transform_0, window_bounds = array<i64: 128, 256>}, {transform_indices = @transform_1, window_bounds = array<i64: 128, 128>}, {pipeline_mode = #tpu.pipeline_mode<synchronous>, transform_indices = @transform_2, window_bounds = array<i64: 384, 128>}, {pipeline_mode = #tpu.pipeline_mode<synchronous>, transform_indices = @transform_3, window_bounds = array<i64: 1, 128>}, {transform_indices = @transform_4, window_bounds = array<i64: 128, 128>}]} {
    %c0 = arith.constant 0 : index
    %c0_0 = arith.constant 0 : index
    %0 = vector.load %arg1[%c0, %c0_0] : memref<128x256xbf16, #tpu.memory_space<vmem>>, vector<128x256xbf16>
    %c0_1 = arith.constant 0 : index
    %c0_2 = arith.constant 0 : index
    %1 = vector.load %arg3[%c0_1, %c0_2] : memref<384x128xbf16, #tpu.memory_space<vmem>>, vector<256x128xbf16>
    %cst = arith.constant dense<0.000000e+00> : vector<128x128xf32>
    %2 = tpu.matmul %0, %1, %cst {dimension_numbers = #tpu.dot_dimension_numbers<[1], [0], [0], [1], [0, 0, 1, 1], [], []>} : vector<128x256xbf16>, vector<256x128xbf16>, vector<128x128xf32> -> vector<128x128xf32>
    %c0_3 = arith.constant 0 : index
    %c0_4 = arith.constant 0 : index
    %3 = vector.load %arg2[%c0_3, %c0_4] : memref<128x128xbf16, #tpu.memory_space<vmem>>, vector<128x128xbf16>
    %c256 = arith.constant 256 : index
    %c0_5 = arith.constant 0 : index
    %4 = vector.load %arg3[%c256, %c0_5] : memref<384x128xbf16, #tpu.memory_space<vmem>>, vector<128x128xbf16>
    %cst_6 = arith.constant dense<0.000000e+00> : vector<128x128xf32>
    %5 = tpu.matmul %3, %4, %cst_6 {dimension_numbers = #tpu.dot_dimension_numbers<[1], [0], [0], [1], [0, 0, 1, 1], [], []>} : vector<128x128xbf16>, vector<128x128xbf16>, vector<128x128xf32> -> vector<128x128xf32>
    %6 = arith.addf %2, %5 : vector<128x128xf32>
    %c0_7 = arith.constant 0 : index
    %c0_8 = arith.constant 0 : index
    %7 = vector.load %arg4[%c0_7, %c0_8] : memref<1x128xf32, #tpu.memory_space<vmem>>, vector<1x128xf32>
    %8 = vector.broadcast %7 : vector<1x128xf32> to vector<128x128xf32>
    %9 = arith.addf %6, %8 : vector<128x128xf32>
    %10 = arith.truncf %9 : vector<128x128xf32> to vector<128x128xbf16>
    %c0_9 = arith.constant 0 : index
    %c0_10 = arith.constant 0 : index
    %11 = vector.load %arg5[%c0_9, %c0_10] : memref<128x128xbf16, #tpu.memory_space<vmem>>, vector<128x128xbf16>
    tpu.vector_store %arg5[%c0_9, %c0_10], %10 {strides = array<i32>} : memref<128x128xbf16, #tpu.memory_space<vmem>>, vector<128x128xbf16>,
    return
  }
  func.func @transform_0(%arg0: i32) -> (i32, i32) {
    %c0_i32 = arith.constant 0 : i32
    %c0_i32_0 = arith.constant 0 : i32
    return %arg0, %c0_i32 : i32, i32
  }
  func.func @transform_1(%arg0: i32) -> (i32, i32) {
    %c0_i32 = arith.constant 0 : i32
    %c0_i32_0 = arith.constant 0 : i32
    return %arg0, %c0_i32 : i32, i32
  }
  func.func @transform_2(%arg0: i32) -> (i32, i32) {
    %c0_i32 = arith.constant 0 : i32
    %c0_i32_0 = arith.constant 0 : i32
    %c0_i32_1 = arith.constant 0 : i32
    return %c0_i32, %c0_i32_0 : i32, i32
  }
  func.func @transform_3(%arg0: i32) -> (i32, i32) {
    %c0_i32 = arith.constant 0 : i32
    %c0_i32_0 = arith.constant 0 : i32
    %c0_i32_1 = arith.constant 0 : i32
    return %c0_i32, %c0_i32_0 : i32, i32
  }
  func.func @transform_4(%arg0: i32) -> (i32, i32) {
    %c0_i32 = arith.constant 0 : i32
    %c0_i32_0 = arith.constant 0 : i32
    return %arg0, %c0_i32 : i32, i32
  }
}

</mosaic_0001>

<bundles_post_ra>
// kernel: tpu_custom_call.1
= control target key start
LH: loop header
LB: loop body
LE: loop exit
PB: predicated region body
PF: predicated region fallthrough
CT: control target
= control target key end

     0   :  { %s1979_s0 = inlined_call_operand.hbm [shape: bf16[256,256], index: 0, kind: input, shape index: {}]   ;;  %s1980_s1 = inlined_call_operand.hbm [shape: bf16[256,128], index: 1, kind: input, shape index: {}]   ;;  %s1981_s2 = inlined_call_operand.hbm [shape: bf16[384,128], index: 2, kind: input, shape index: {}]   ;;  %s1982_s3 = inlined_call_operand.vmem [shape: f32[1,128], index: 3, kind: input, shape index: {}]   ;;  %s1983_s4 = inlined_call_operand.hbm [shape: bf16[256,128], index: 4, kind: output, shape index: {}]  }
   0x1   :  { %1989 = sst [smem:[#allocation13_spill]] %s1979_s0 }
   0x2   :  { %1990 = sst [smem:[#allocation14_spill]] %s1981_s2 }
   0x3   :  { %9 = vsyncpa [#allocation3], 0 }
   0x4   :  { %11 = vsyncpa [#allocation3 + $0x1], 0 }
   0x5   :  { %12 = vsyncpa [#allocation6], 0 }
   0x6   :  { %14 = vsyncpa [#allocation6 + $0x1], 0 }
   0x7   :  { %15 = vsyncpa [#allocation4], 0 }
   0x8   :  { %17 = vsyncpa [#allocation4 + $0x1], 0  ;;  %s1647_s15 = smov 0   ;;  %s1649_s16 = smov 0  }
   0x9   :  { %s1651_s17 = smov 0   ;;  %s1653_s18 = smov 0  }
   0xa LB: > { %s1668_s19 = sadd.s32 4294967295, %s1610_s18   ;;  %s1043_s20 = sadd.s32 4294967294, %s1610_s18   ;;  %s1610_s18 = sphi %s1653_s18, %s2011_s18   ;;  %s1606_s17 = sphi %s1651_s17, %s2010_s17   ;;  %s1602_s16 = sphi %s1649_s16, %s2009_s16   ;;  %s1598_s15 = sphi %s1647_s15, %s2008_s15  }
   0xb   : > { %p43_p0 = scmp.ne.s32.totalorder %s1602_s16, %s1598_s15  ;;  %p1984_p1 = scmp.eq.s32.totalorder %s1668_s19, 0 }
   0xc   : > { %p141_p3 = scmp.eq.s32.totalorder %s1043_s20, 1  ;;  %p1044_p5 = scmp.ge.s32.totalorder %s1610_s18, 1 }
   0xd   : > { %p1677_p4 = por %p1984_p1, %p43_p0  ;;  %p148_p7 = scmp.lt.s32.totalorder %s1610_s18, 3 }
   0xe   : > { %p1682_p6 = por %p141_p3, %p43_p0  ;;  %s1612_s24 = smov [#allocation7]  }
   0xf   : > { %s1991_s21 = scalar_select %p1677_p4, 1, 0 }
  0x10   : > { %s1992_s22 = scalar_select %p1682_p6, 1, 0 }
  0x11   : > { %p1687_p8 = pnand %p1044_p5, %p148_p7  ;;  %s160_s25 = sshll.u32 %s1612_s24, 4  ;;  %s1691_s25 = int_to_ptr.vmem [resolvable:$true] %s160_s25 }
  0x12   : > { %s1703_s27 = sadd.s32 1, %s1610_s18   ;;  %s30_s28 = sadd.s32 1, %s1606_s17 }
  0x13   : > { %s1993_s23 = scalar_select %p1687_p8, 1, 0 }
  0x14   : > { %p1334_p9 = pneg %p1687_p8  ;;  %s27_s29 = ssub.s32 %s1610_s18, %s1703_s27 }
  0x15   : > { %s1995_s2 = sld [smem:[#allocation14_spill]] }
  0x16   : > { %p1698_p11 = pnand %p1334_p9, %p1984_p1 }
  0x18   : > { %p1450_p13 = pneg %p1698_p11 }
  0x1b   : > { %s1448_s6 = scalar_lea.hbm %s1995_s2, 3072 }
  0x1c   : > { %p1449_p12 = scmp.ne.s32.totalorder %s1995_s2, %s1448_s6  ;;  %p1455_p5 = scmp.lt.u32.totalorder %s1448_s6, %s1995_s2 }
  0x1e   : > { %p1451_p0 = pnand %p1450_p13, %p1449_p12 }
  0x20   : > { %p1452_p3 = pneg %p1451_p0 }
  0x22   : > { %p1457_p7 = pnand %p1455_p5, %p1452_p3 }
  0x24   : > { %1460 = shalt.err (!%p1457_p7)
}
  0x25   : > { %s1461_s11 = scalar_lea.vmem %s1691_s25, 3072  ;;  %p1469_p2 = scmp.lt.s32.totalorder %s1691_s25, %s1691_s25 }
  0x26   : > { %p1462_p9 = scmp.ne.s32.totalorder %s1691_s25, %s1461_s11  ;;  %p1470_p6 = scmp.lt.s32.totalorder %s1461_s11, %s1461_s11 }
  0x28   : > { %p1464_p10 = pnand %p1462_p9, %p1450_p13  ;;  %p1471_p4 = por %p1470_p6, %p1469_p2 }
  0x2a   : > { %p1465_p1 = pneg %p1464_p10 }
  0x2c   : > { %p1472_p8 = pnand %p1471_p4, %p1465_p1 }
  0x2e   : > { %1475 = shalt.err (!%p1472_p8)
}
  0x2f   : > { %s1987_s12 = smov 64   ;;  %s1988_s13 = smov 4  }
  0x30   : > { %1337 = dma.hbm_to_vmem [thread:$0]  (!%p1698_p11), %s1995_s2, 3072, %s1691_s25, [#allocation6], %s1987_s12, %s1987_s12, %s1988_s13  }
  0x31   : > { %p28_p1 = scmp.eq.s32.totalorder %s27_s29, 0  ;;  %p37_p2 = scmp.ne.s32.totalorder %s1606_s17, %s1602_s16 }
  0x32   : > { %p38_p4 = scmp.eq.s32.totalorder %s1610_s18, 0  ;;  %p1350_p6 = scmp.lt.s32.totalorder %s1610_s18, 2 }
  0x33   : > { %s1737_s24 = scalar_select %p28_p1, %s1606_s17, %s30_s28  }
  0x34   : > { %p39_p8 = por %p38_p4, %p37_p2  ;;  %p1996_p10 = scmp.eq.s32.totalorder %s1668_s19, 1 }
  0x35   : > { %s1746_s26 = sand.u32 1, %s1606_s17   ;;  %s1130_s5 = sshll.u32 %s1610_s18, 11 }
  0x36   : > { %p1741_p12 = por %p1996_p10, %p37_p2  ;;  %s1047_s6 = sshll.u32 %s1746_s26, 7 }
  0x37   : > { %s1998_s0 = sld [smem:[#allocation13_spill]]  ;;  %s181_s28 = scalar_lea.vmem [#allocation2], %s1047_s6 }
  0x38   : > { %s189_s8 = sshll.u32 %s181_s28, 4  ;;  %p1755_p11 = pnand %p1350_p6, %p39_p8  ;;  %s1759_s8 = int_to_ptr.vmem [resolvable:$true] %s189_s8 }
  0x39   : > { %s178_s10 = scalar_lea.sflag [#allocation3], %s1746_s26 }
  0x3a   : > { %p1478_p0 = pneg %p1755_p11 }
  0x3d   : > { %s1753_s29 = scalar_lea.hbm %s1998_s0, %s1130_s5  ;;  %s1481_s5 = scalar_lea.hbm %s1998_s0, 4096 }
  0x3e   : > { %s1476_s11 = scalar_lea.hbm %s1753_s29, 2048  ;;  %p1482_p7 = scmp.lt.u32.totalorder %s1753_s29, %s1998_s0 }
  0x3f   : > { %p1477_p13 = scmp.ne.s32.totalorder %s1753_s29, %s1476_s11  ;;  %p1483_p9 = scmp.lt.u32.totalorder %s1481_s5, %s1476_s11 }
  0x40   : > { %p1485_p2 = scmp.lt.u32.totalorder %s1476_s11, %s1753_s29 }
  0x41   : > { %p1479_p3 = pnand %p1478_p0, %p1477_p13  ;;  %p1484_p1 = por %p1483_p9, %p1482_p7 }
  0x43   : > { %p1480_p5 = pneg %p1479_p3  ;;  %p1486_p4 = por %p1485_p2, %p1484_p1 }
  0x45   : > { %p1487_p6 = pnand %p1486_p4, %p1480_p5 }
  0x47   : > { %1490 = shalt.err (!%p1487_p6)
}
  0x48   : > { %s1491_s25 = scalar_lea.vmem %s1759_s8, 2048  ;;  %s1615_s28 = smov [#allocation2]  }
  0x49   : > { %p1492_p8 = scmp.ne.s32.totalorder %s1759_s8, %s1491_s25  ;;  %s1496_s14 = sshll.u32 %s1615_s28, 4  ;;  %s1497_s14 = int_to_ptr.vmem [resolvable:$false] %s1496_s14 }
  0x4a   : > { %s1498_s20 = scalar_lea.vmem %s1497_s14, 4096  ;;  %p1499_p3 = scmp.lt.s32.totalorder %s1759_s8, %s1497_s14 }
  0x4b   : > { %p1494_p10 = pnand %p1492_p8, %p1478_p0  ;;  %p1500_p7 = scmp.lt.s32.totalorder %s1498_s20, %s1491_s25 }
  0x4d   : > { %p1495_p13 = pneg %p1494_p10  ;;  %p1501_p9 = por %p1500_p7, %p1499_p3 }
  0x4f   : > { %p1502_p1 = pnand %p1501_p9, %p1495_p13 }
  0x51   : > { %1505 = shalt.err (!%p1502_p1)
}
  0x52   : > { %s1616_s11 = smov 128   ;;  %s1617_s5 = smov 8  }
  0x53   : > { %1341 = dma.hbm_to_vmem [thread:$0]  (!%p1755_p11), %s1753_s29, 2048, %s1759_s8, %s178_s10, %s1616_s11, %s1616_s11, %s1617_s5  }
  0x54   : > { %s199_s6 = sand.u32 1, %s1610_s18   ;;  %s1051_s7 = sshll.u32 %s1746_s26, 6 }
  0x55   : > { %s1131_s28 = sshll.u32 %s1610_s18, 10  ;;  %s203_s25 = scalar_lea.vmem [#allocation5], %s1051_s7 }
  0x56   : > { %s210_s14 = sshll.u32 %s203_s25, 4  ;;  %s1795_s13 = scalar_lea.hbm %s1980_s1, %s1131_s28  ;;  %s1797_s14 = int_to_ptr.vmem [resolvable:$true] %s210_s14 }
  0x57   : > { %s1799_s0 = scalar_lea.sflag [#allocation6], %s199_s6  ;;  %s1506_s2 = scalar_lea.hbm %s1795_s13, 1024 }
  0x58   : > { %p1507_p5 = scmp.ne.s32.totalorder %s1795_s13, %s1506_s2  ;;  %s1511_s12 = scalar_lea.hbm %s1980_s1, 2048 }
  0x59   : > { %p1512_p6 = scmp.lt.u32.totalorder %s1795_s13, %s1980_s1  ;;  %p1513_p8 = scmp.lt.u32.totalorder %s1511_s12, %s1506_s2 }
  0x5a   : > { %p1509_p2 = pnand %p1507_p5, %p1478_p0  ;;  %p1515_p13 = scmp.lt.u32.totalorder %s1506_s2, %s1795_s13 }
  0x5b   : > { %p1514_p10 = por %p1513_p8, %p1512_p6 }
  0x5c   : > { %p1510_p4 = pneg %p1509_p2 }
  0x5d   : > { %p1516_p3 = por %p1515_p13, %p1514_p10 }
  0x5f   : > { %p1517_p7 = pnand %p1516_p3, %p1510_p4 }
  0x61   : > { %1520 = shalt.err (!%p1517_p7)
}
  0x62   : > { %s1521_s11 = scalar_lea.vmem %s1797_s14, 1024  ;;  %s1618_s5 = smov [#allocation5]  }
  0x63   : > { %p1522_p9 = scmp.ne.s32.totalorder %s1797_s14, %s1521_s11  ;;  %s1526_s6 = sshll.u32 %s1618_s5, 4  ;;  %s1527_s6 = int_to_ptr.vmem [resolvable:$false] %s1526_s6 }
  0x64   : > { %s1528_s7 = scalar_lea.vmem %s1527_s6, 2048  ;;  %p1529_p2 = scmp.lt.s32.totalorder %s1797_s14, %s1527_s6 }
  0x65   : > { %p1524_p1 = pnand %p1522_p9, %p1478_p0  ;;  %p1530_p6 = scmp.lt.s32.totalorder %s1528_s7, %s1521_s11 }
  0x67   : > { %p1525_p5 = pneg %p1524_p1  ;;  %p1531_p8 = por %p1530_p6, %p1529_p2 }
  0x69   : > { %p1532_p10 = pnand %p1531_p8, %p1525_p5 }
  0x6b   : > { %1535 = shalt.err (!%p1532_p10)
}
  0x6c   : > { %s2000_s2 = smov 4   ;;  %s2001_s28 = smov 64  }
  0x6d   : > { %1344 = dma.hbm_to_vmem [thread:$0]  (!%p1755_p11), %s1795_s13, 1024, %s1797_s14, %s1799_s0, %s2001_s28, %s2001_s28, %s2000_s2  }
  0x6e   : > { %p2002_p0 = scmp.ne.s32.totalorder %s1993_s23, 0 }
  0x6f   : > { %s1831_s25 = sand.u32 (!%p2002_p0), 1, %s1602_s16   ;;  %p2003_p4 = scmp.ne.s32.totalorder (!%p2002_p0), %s1991_s21, 0 }
  0x70   : > { %222 = sbr.rel (%p2002_p0) target bundleno = 438 (0x1b6), region = 36  ;;  %s1055_s20 = sshll.u32 (!%p2002_p0), %s1831_s25, 7 }
  0x71   : > { %s225_s26 = scalar_lea.sflag (!%p2002_p0), [#allocation3], %s1831_s25  ;;  %s1835_s29 = scalar_lea.vmem (!%p2002_p0), [#allocation2], %s1055_s20 }
  0x77   : > { %1581 = dma.done.wait (%p2003_p4), %s225_s26, 2048  }
  0x78   : > { %1583 = vsyncadd (%p2003_p4), %s225_s26, 4294965248  ;;  %s233_s0 = sand.u32 1, %s1668_s19   ;;  %s1056_s23 = sshll.u32 %s1831_s25, 6 }
  0x79   : > { %s234_s13 = scalar_lea.sflag [#allocation6], %s233_s0  ;;  %s1845_s9 = scalar_lea.vmem [#allocation5], %s1056_s23 }
  0x7a   : > { %1585 = dma.done.wait (%p2003_p4), %s234_s13, 1024  }
  0x7b   : > { %1587 = vsyncadd (%p2003_p4), %s234_s13, 4294966272  ;;  %p2004_p11 = scmp.eq.s32.totalorder %s1668_s19, 0 }
  0x7d   : > { %1589 = dma.done.wait (%p2004_p11), [#allocation6], 3072   ;;  %p2005_p13 = pmov %p2004_p11 }
  0x7e   : > { %v1392_v0 = vld [vmem:[#allocation7 + $0x80] sm:$0xff]   ;;  %v1395_v3 = vld [vmem:[#allocation7 + $0x88] sm:$0xff]   ;;  %v1398_v6 = vld [vmem:[#allocation7 + $0x90] sm:$0xff]   ;;  %s1902_s12 = scalar_lea.vmem [#allocation8], %s1056_s23  ;;  %s1148_s8 = sshll.u32 %s1668_s19, 10 }
  0x7f   : > { %1591 = vsyncadd (%p2005_p13), [#allocation6], 4294964224  ;;  %v1393_v1 = vld [vmem:[#allocation7 + $0x40] sm:$0xff]   ;;  %1276 = vmatprep.subr.bf16.mxu0 %v1392_v0  ;;  %v1396_v4 = vld [vmem:[#allocation7 + $0x48] sm:$0xff]   ;;  %s938_s10 = sshll.u32 %s1902_s12, 4  ;;  %s1931_s6 = scalar_lea.hbm %s1983_s4, %s1148_s8  ;;  %s1933_s10 = int_to_ptr.vmem [resolvable:$true] %s938_s10 }
  0x80   : > { %v1855_v2 = vld [vmem:[#allocation7] sm:$0xff]   ;;  %1308 = vmatprep.subr.bf16.mxu1 %v1393_v1  ;;  %1277 = vmatpush3.bf16.msra.mxu0 %v1392_v0  ;;  %v1397_v5 = vld [vmem:[#allocation7 + $0x8] sm:$0xff]   ;;  %v1399_v7 = vld [vmem:[#allocation7 + $0x50] sm:$0xff]   ;;  %s925_s19 = scalar_lea.sflag [#allocation4], %s1831_s25  ;;  %s1536_s7 = scalar_lea.vmem %s1933_s10, 1024 }
  0x81   : > { %1316 = vmatpush3.bf16.msra.mxu1 %v1855_v2  ;;  %1278 = vmatprep.subr.bf16.mxu0 %v1395_v3  ;;  %v1400_v8 = vld [vmem:[#allocation7 + $0x10] sm:$0xff]   ;;  %v1401_v9 = vld [vmem:[#allocation7 + $0x98] sm:$0xff]   ;;  %v1404_v12 = vld [vmem:[#allocation7 + $0xa0] sm:$0xff]   ;;  %p1537_p3 = scmp.ne.s32.totalorder %s1933_s10, %s1536_s7  ;;  %s1619_s2 = smov [#allocation8]  }
  0x82   : > { %1309 = vmatprep.subr.bf16.mxu1 %v1396_v4  ;;  %v1402_v10 = vld [vmem:[#allocation7 + $0x58] sm:$0xff]   ;;  %v1405_v13 = vld [vmem:[#allocation7 + $0x60] sm:$0xff]   ;;  %v1407_v15 = vld [vmem:[#allocation7 + $0xa8] sm:$0xff]   ;;  %s1540_s28 = sshll.u32 %s1619_s2, 4  ;;  %s1541_s28 = int_to_ptr.vmem [resolvable:$false] %s1540_s28 }
  0x83   : > { %v1403_v11 = vld [vmem:[#allocation7 + $0x18] sm:$0xff]   ;;  %v1406_v14 = vld [vmem:[#allocation7 + $0x20] sm:$0xff]   ;;  %v1408_v16 = vld [vmem:[#allocation7 + $0x68] sm:$0xff]   ;;  %p1538_p7 = pnand %p1537_p3, %p1741_p12  ;;  %s1542_s20 = scalar_lea.vmem %s1541_s28, 2048 }
  0x84   : > { %1279 = vmatpush3.bf16.msra.mxu0 %v1395_v3  ;;  %v1409_v17 = vld [vmem:[#allocation7 + $0x28] sm:$0xff]   ;;  %v1410_v18 = vld [vmem:[#allocation7 + $0xb0] sm:$0xff]   ;;  %v1413_v21 = vld [vmem:[#allocation7 + $0xb8] sm:$0xff]   ;;  %p1543_p1 = scmp.lt.s32.totalorder %s1933_s10, %s1541_s28  ;;  %p1544_p5 = scmp.lt.s32.totalorder %s1542_s20, %s1536_s7 }
  0x85   : > { %1317 = vmatpush3.bf16.msra.mxu1 %v1397_v5  ;;  %1280 = vmatprep.subr.bf16.mxu0 %v1398_v6  ;;  %v1411_v19 = vld [vmem:[#allocation7 + $0x70] sm:$0xff]   ;;  %v1416_v22 = vld [vmem:[%s1845_s9] sm:$0xff]   ;;  %v1414_v23 = vld [vmem:[#allocation7 + $0x78] sm:$0xff]   ;;  %p1539_p9 = pneg %p1538_p7 }
  0x86   : > { %1310 = vmatprep.subr.bf16.mxu1 %v1399_v7  ;;  %v1412_v20 = vld [vmem:[#allocation7 + $0x30] sm:$0xff]   ;;  %1292 = vmatprep.mubr.bf16.mxu0 %v1416_v22  ;;  %v1419_v24 = vld [vmem:[%s1835_s29 + $0x24] ss:$8 sps:$4 sm:$0xff]   ;;  %v1415_v25 = vld [vmem:[#allocation7 + $0x38] sm:$0xff]   ;;  %p1545_p2 = por %p1544_p5, %p1543_p1 }
  0x87   : > { %772 = vmatprep.mubr.bf16.mxu1 %v1419_v24  ;;  %v1420_v26 = vld [vmem:[%s1845_s9 + $0x8] sm:$0xff]   ;;  %v1421_v28 = vld [vmem:[%s1845_s9 + $0x10] sm:$0xff]   ;;  %v1424_v30 = vld [vmem:[%s1845_s9 + $0x18] sm:$0xff]  }
  0x88   : > { %1281 = vmatpush3.bf16.msra.mxu0 %v1398_v6  ;;  %v1417_v27 = vld [vmem:[%s1835_s29 + $0x20] ss:$8 sps:$4 sm:$0xff]   ;;  %v1422_v29 = vld [vmem:[%s1835_s29 + $0x34] ss:$8 sps:$4 sm:$0xff]   ;;  %v1425_v31 = vld [vmem:[%s1835_s29 + $0x30] ss:$8 sps:$4 sm:$0xff]   ;;  %p1546_p6 = pnand %p1545_p2, %p1539_p9 }
  0x89   : > { %1318 = vmatpush3.bf16.msra.mxu1 %v1400_v8  ;;  %1282 = vmatprep.subr.bf16.mxu0 %v1401_v9  ;;  %v1426_v32 = vld [vmem:[%s1845_s9 + $0x20] sm:$0xff]   ;;  %v1429_v34 = vld [vmem:[%s1845_s9 + $0x28] sm:$0xff]   ;;  %v1431_v36 = vld [vmem:[%s1845_s9 + $0x30] sm:$0xff]  }
  0x8a   : > { %1311 = vmatprep.subr.bf16.mxu1 %v1402_v10  ;;  %v1427_v33 = vld [vmem:[%s1835_s29 + $0x44] ss:$8 sps:$4 sm:$0xff]   ;;  %v1430_v35 = vld [vmem:[%s1835_s29 + $0x40] ss:$8 sps:$4 sm:$0xff]   ;;  %v1432_v37 = vld [vmem:[%s1835_s29 + $0x54] ss:$8 sps:$4 sm:$0xff]  }
  0x8b   : > { %v1434_v38 = vld [vmem:[%s1845_s9 + $0x38] sm:$0xff]   ;;  %v1438_v40 = vld [vmem:[%s1835_s29 + $0x4] ss:$8 sps:$4 sm:$0xff]   ;;  %v1436_v42 = vld [vmem:[%s1835_s29] ss:$8 sps:$4 sm:$0xff]  }
  0x8c   : > { %1283 = vmatpush3.bf16.msra.mxu0 %v1401_v9  ;;  %v1435_v39 = vld [vmem:[%s1835_s29 + $0x50] ss:$8 sps:$4 sm:$0xff]   ;;  %v1439_v41 = vld [vmem:[%s1835_s29 + $0x64] ss:$8 sps:$4 sm:$0xff]   ;;  %v1441_v43 = vld [vmem:[%s1835_s29 + $0x60] ss:$8 sps:$4 sm:$0xff]  }
  0x8d   : > { %1319 = vmatpush3.bf16.msra.mxu1 %v1403_v11  ;;  %1284 = vmatprep.subr.bf16.mxu0 %v1404_v12  ;;  %v1442_v44 = vld [vmem:[%s1835_s29 + $0x14] ss:$8 sps:$4 sm:$0xff]   ;;  %v1446_v46 = vld [vmem:[%s1835_s29 + $0x10] ss:$8 sps:$4 sm:$0xff]   ;;  %v1894_v0 = vld [vmem:[%s1982_s3] ss:$0 sm:$0xff] }
  0x8e   : > { %1312 = vmatprep.subr.bf16.mxu1 %v1405_v13  ;;  %v1444_v45 = vld [vmem:[%s1835_s29 + $0x74] ss:$8 sps:$4 sm:$0xff]   ;;  %v1447_v47 = vld [vmem:[%s1835_s29 + $0x70] ss:$8 sps:$4 sm:$0xff]  }
  0x90   : > { %1285 = vmatpush3.bf16.msra.mxu0 %v1404_v12 }
  0x91   : > { %1320 = vmatpush3.bf16.msra.mxu1 %v1406_v14  ;;  %1286 = vmatprep.subr.bf16.mxu0 %v1407_v15 }
  0x92   : > { %1313 = vmatprep.subr.bf16.mxu1 %v1408_v16 }
  0x94   : > { %1287 = vmatpush3.bf16.msra.mxu0 %v1407_v15 }
  0x95   : > { %1321 = vmatpush3.bf16.msra.mxu1 %v1409_v17  ;;  %1288 = vmatprep.subr.bf16.mxu0 %v1410_v18 }
  0x96   : > { %1314 = vmatprep.subr.bf16.mxu1 %v1411_v19 }
  0x98   : > { %1289 = vmatpush3.bf16.msra.mxu0 %v1410_v18 }
  0x99   : > { %1322 = vmatpush3.bf16.msra.mxu1 %v1412_v20  ;;  %1290 = vmatprep.subr.bf16.mxu0 %v1413_v21 }
  0x9a   : > { %1315 = vmatprep.subr.bf16.mxu1 %v1414_v23 }
  0x9c   : > { %1291 = vmatpush3.bf16.msra.mxu0 %v1413_v21 }
  0x9d   : > { %1323 = vmatpush3.bf16.msra.mxu1 %v1415_v25  ;;  %1212 = vmatprep.subr.bf16.mxu0 %v1393_v1 }
  0x9f   : > { %1293 = vmatmul.mubr.bf16.vlgmr.msra.gmra.mrb[0].mxu0 %v1420_v26 }
  0xa0   : > { %773 = vmatmul.mubr.bf16.vlgmr.msra.gmra.mrb[0].mxu1 %v1417_v27  ;;  %1213 = vmatpush3.bf16.msra.mxu0 %v1855_v2 }
  0xa1   : > { %1214 = vmatprep.subr.bf16.mxu0 %v1396_v4  ;;  %1296 = vmatprep.mubr.bf16.mxu0 %v1421_v28 }
  0xa2   : > { %780 = vmatprep.mubr.bf16.mxu1 %v1422_v29 }
  0xa4   : > { %1215 = vmatpush3.bf16.msra.mxu0 %v1397_v5 }
  0xa5   : > { %1216 = vmatprep.subr.bf16.mxu0 %v1399_v7 }
  0xa7   : > { %1297 = vmatmul.mubr.bf16.gmra.mrb[4].mxu0 %v1424_v30 }
  0xa8   : > { %781 = vmatmul.mubr.bf16.gmra.mrb[4].mxu1 %v1425_v31  ;;  %1217 = vmatpush3.bf16.msra.mxu0 %v1400_v8 }
  0xa9   : > { %1218 = vmatprep.subr.bf16.mxu0 %v1402_v10  ;;  %1300 = vmatprep.mubr.bf16.mxu0 %v1426_v32 }
  0xaa   : > { %788 = vmatprep.mubr.bf16.mxu1 %v1427_v33 }
  0xac   : > { %1219 = vmatpush3.bf16.msra.mxu0 %v1403_v11 }
  0xad   : > { %1220 = vmatprep.subr.bf16.mxu0 %v1405_v13 }
  0xaf   : > { %1301 = vmatmul.mubr.bf16.gmra.mrb[8].mxu0 %v1429_v34 }
  0xb0   : > { %789 = vmatmul.mubr.bf16.gmra.mrb[8].mxu1 %v1430_v35  ;;  %1221 = vmatpush3.bf16.msra.mxu0 %v1406_v14 }
  0xb1   : > { %1222 = vmatprep.subr.bf16.mxu0 %v1408_v16  ;;  %1304 = vmatprep.mubr.bf16.mxu0 %v1431_v36 }
  0xb2   : > { %796 = vmatprep.mubr.bf16.mxu1 %v1432_v37 }
  0xb4   : > { %1223 = vmatpush3.bf16.msra.mxu0 %v1409_v17 }
  0xb5   : > { %1224 = vmatprep.subr.bf16.mxu0 %v1411_v19 }
  0xb7   : > { %1305 = vmatmul.mubr.bf16.gmra.mrb[12].mxu0 %v1434_v38 }
  0xb8   : > { %797 = vmatmul.mubr.bf16.gmra.mrb[12].mxu1 %v1435_v39  ;;  %1225 = vmatpush3.bf16.msra.mxu0 %v1412_v20 }
  0xb9   : > { %1226 = vmatprep.subr.bf16.mxu0 %v1414_v23  ;;  %756 = vmatprep.mubr.bf16.mxu0 %v1438_v40 }
  0xba   : > { %804 = vmatprep.mubr.bf16.mxu1 %v1439_v41 }
  0xbc   : > { %1227 = vmatpush3.bf16.msra.mxu0 %v1415_v25 }
  0xbf   : > { %757 = vmatmul.mubr.bf16.vlgmr.msra.gmra.mrb[16].mxu0 %v1436_v42 }
  0xc0   : > { %805 = vmatmul.mubr.bf16.gmra.mrb[16].mxu1 %v1441_v43  ;;  %764 = vmatprep.mubr.bf16.mxu0 %v1442_v44 }
  0xc1   : > { %812 = vmatprep.mubr.bf16.mxu1 %v1444_v45 }
  0xc7   : > { %765 = vmatmul.mubr.bf16.gmra.mrb[20].mxu0 %v1446_v46 }
  0xc8   : > { %813 = vmatmul.mubr.bf16.gmra.mrb[20].mxu1 %v1447_v47 }
 0x172   : > { %v1883_v48 = vpop.f32.mrb[0].mxu0 }
 0x173   : > { %v1240_v49 = vpop.f32.mrb[0].mxu1  ;;  %v1885_v50 = vpop.f32.mrb[1].mxu0 }
 0x174   : > { %v1241_v51 = vpop.f32.mrb[1].mxu1  ;;  %v1887_v52 = vpop.f32.mrb[2].mxu0 }
 0x175   : > { %v1242_v53 = vadd.f32 %v1241_v51, %v1240_v49  ;;  %v1243_v54 = vpop.f32.mrb[2].mxu1  ;;  %v1889_v55 = vpop.f32.mrb[3].mxu0 }
 0x176   : > { %v1244_v56 = vpop.f32.mrb[3].mxu1 }
 0x177   : > { %v1245_v57 = vadd.f32 %v1244_v56, %v1243_v54 }
 0x17a   : > { %v1298_v58 = vpop.f32.mrb[4].mxu0 }
 0x17b   : > { %v1246_v59 = vpop.f32.mrb[4].mxu1  ;;  %v501_v60 = vpop.f32.mrb[5].mxu0 }
 0x17c   : > { %v775_v61 = vadd.f32 %v1242_v53, %v501_v60  ;;  %v1247_v62 = vpop.f32.mrb[5].mxu1  ;;  %v1299_v63 = vpop.f32.mrb[6].mxu0 }
 0x17d   : > { %v1248_v1 = vadd.f32 %v1247_v62, %v1246_v59  ;;  %v1249_v2 = vpop.f32.mrb[6].mxu1  ;;  %v504_v3 = vpop.f32.mrb[7].mxu0 }
 0x17e   : > { %v778_v4 = vadd.f32 %v1245_v57, %v504_v3  ;;  %v1250_v5 = vpop.f32.mrb[7].mxu1  ;;  %v832_v8 = vadd.f32 %v1894_v0, %v775_v61 }
 0x17f   : > { %v783_v6 = vadd.f32 %v1298_v58, %v1248_v1  ;;  %v1251_v7 = vadd.f32 %v1250_v5, %v1249_v2 }
 0x180   : > { %v833_v9 = vadd.f32 %v1894_v0, %v778_v4 }
 0x181   : > { %v786_v10 = vadd.f32 %v1299_v63, %v1251_v7  ;;  %v834_v13 = vadd.f32 %v1894_v0, %v783_v6 }
 0x182   : > { %v1162_v11 = vpack.c.bf16 %v833_v9, %v832_v8  ;;  %v1302_v12 = vpop.f32.mrb[8].mxu0 }
 0x183   : > { %v835_v14 = vadd.f32 %v1894_v0, %v786_v10  ;;  %v1252_v15 = vpop.f32.mrb[8].mxu1  ;;  %v517_v16 = vpop.f32.mrb[9].mxu0 }
 0x184   : > { %1190 = vst [vmem:[%s1902_s12 + $0x10] sm:$0xff] %v1162_v11   ;;  %v1253_v17 = vpop.f32.mrb[9].mxu1  ;;  %v1303_v18 = vpop.f32.mrb[10].mxu0 }
 0x185   : > { %v1167_v19 = vpack.c.bf16 %v835_v14, %v834_v13  ;;  %v1254_v20 = vadd.f32 %v1253_v17, %v1252_v15  ;;  %v1255_v21 = vpop.f32.mrb[10].mxu1  ;;  %v520_v22 = vpop.f32.mrb[11].mxu0 }
 0x186   : > { %v1256_v23 = vpop.f32.mrb[11].mxu1 }
 0x187   : > { %1191 = vst [vmem:[%s1902_s12 + $0x18] sm:$0xff] %v1167_v19   ;;  %v791_v24 = vadd.f32 %v1254_v20, %v517_v16  ;;  %v1257_v25 = vadd.f32 %v1256_v23, %v1255_v21 }
 0x189   : > { %v794_v26 = vadd.f32 %v1257_v25, %v520_v22  ;;  %v836_v28 = vadd.f32 %v1894_v0, %v791_v24 }
 0x18a   : > { %v1306_v27 = vpop.f32.mrb[12].mxu0 }
 0x18b   : > { %v837_v29 = vadd.f32 %v1894_v0, %v794_v26  ;;  %v1258_v30 = vpop.f32.mrb[12].mxu1  ;;  %v533_v31 = vpop.f32.mrb[13].mxu0 }
 0x18c   : > { %v1259_v32 = vpop.f32.mrb[13].mxu1  ;;  %v1307_v33 = vpop.f32.mrb[14].mxu0 }
 0x18d   : > { %v1172_v34 = vpack.c.bf16 %v837_v29, %v836_v28  ;;  %v1260_v35 = vadd.f32 %v1259_v32, %v1258_v30  ;;  %v1261_v36 = vpop.f32.mrb[14].mxu1  ;;  %v536_v37 = vpop.f32.mrb[15].mxu0 }
 0x18e   : > { %v1262_v38 = vpop.f32.mrb[15].mxu1 }
 0x18f   : > { %1192 = vst [vmem:[%s1902_s12 + $0x20] sm:$0xff] %v1172_v34   ;;  %v799_v39 = vadd.f32 %v1302_v12, %v1260_v35  ;;  %v1263_v40 = vadd.f32 %v1262_v38, %v1261_v36 }
 0x191   : > { %v802_v41 = vadd.f32 %v1303_v18, %v1263_v40  ;;  %v838_v43 = vadd.f32 %v1894_v0, %v799_v39 }
 0x192   : > { %v1228_v42 = vpop.f32.mrb[16].mxu0 }
 0x193   : > { %v839_v44 = vadd.f32 %v1894_v0, %v802_v41  ;;  %v1264_v45 = vpop.f32.mrb[16].mxu1  ;;  %v1229_v46 = vpop.f32.mrb[17].mxu0 }
 0x194   : > { %v1230_v47 = vadd.f32 %v1229_v46, %v1228_v42  ;;  %v1265_v49 = vpop.f32.mrb[17].mxu1  ;;  %v1231_v51 = vpop.f32.mrb[18].mxu0 }
 0x195   : > { %v1177_v53 = vpack.c.bf16 %v839_v44, %v838_v43  ;;  %v1266_v54 = vadd.f32 %v1265_v49, %v1264_v45  ;;  %v1267_v56 = vpop.f32.mrb[18].mxu1  ;;  %v1232_v57 = vpop.f32.mrb[19].mxu0 }
 0x196   : > { %v759_v58 = vadd.f32 %v1230_v47, %v1885_v50  ;;  %v1233_v59 = vadd.f32 %v1232_v57, %v1231_v51  ;;  %v1268_v60 = vpop.f32.mrb[19].mxu1 }
 0x197   : > { %1193 = vst [vmem:[%s1902_s12 + $0x28] sm:$0xff] %v1177_v53   ;;  %v807_v61 = vadd.f32 %v1266_v54, %v533_v31  ;;  %v1269_v62 = vadd.f32 %v1268_v60, %v1267_v56 }
 0x198   : > { %v762_v63 = vadd.f32 %v1233_v59, %v1889_v55  ;;  %v828_v2 = vadd.f32 %v1894_v0, %v759_v58 }
 0x199   : > { %v810_v1 = vadd.f32 %v1269_v62, %v536_v37  ;;  %v840_v5 = vadd.f32 %v1894_v0, %v807_v61 }
 0x19a   : > { %v829_v3 = vadd.f32 %v1894_v0, %v762_v63  ;;  %v1234_v4 = vpop.f32.mrb[20].mxu0 }
 0x19b   : > { %v841_v6 = vadd.f32 %v1894_v0, %v810_v1  ;;  %v1270_v50 = vpop.f32.mrb[20].mxu1  ;;  %v1235_v7 = vpop.f32.mrb[21].mxu0 }
 0x19c   : > { %v1152_v8 = vpack.c.bf16 %v829_v3, %v828_v2  ;;  %v1236_v9 = vadd.f32 %v1235_v7, %v1234_v4  ;;  %v1271_v10 = vpop.f32.mrb[21].mxu1  ;;  %v1237_v55 = vpop.f32.mrb[22].mxu0 }
 0x19d   : > { %v1182_v11 = vpack.c.bf16 %v841_v6, %v840_v5  ;;  %v1272_v12 = vadd.f32 %v1271_v10, %v1270_v50  ;;  %v1273_v13 = vpop.f32.mrb[22].mxu1  ;;  %v1238_v14 = vpop.f32.mrb[23].mxu0 }
 0x19e   : > { %1153 = vst [vmem:[%s1902_s12] sm:$0xff] %v1152_v8   ;;  %v767_v15 = vadd.f32 %v1883_v48, %v1236_v9  ;;  %v1239_v16 = vadd.f32 %v1238_v14, %v1237_v55  ;;  %v1274_v17 = vpop.f32.mrb[23].mxu1 }
 0x19f   : > { %1194 = vst [vmem:[%s1902_s12 + $0x30] sm:$0xff] %v1182_v11   ;;  %v815_v18 = vadd.f32 %v1306_v27, %v1272_v12  ;;  %v1275_v19 = vadd.f32 %v1274_v17, %v1273_v13 }
 0x1a0   : > { %v770_v20 = vadd.f32 %v1887_v52, %v1239_v16  ;;  %v830_v22 = vadd.f32 %v1894_v0, %v767_v15 }
 0x1a1   : > { %v818_v21 = vadd.f32 %v1307_v33, %v1275_v19  ;;  %v842_v48 = vadd.f32 %v1894_v0, %v815_v18 }
 0x1a2   : > { %v831_v23 = vadd.f32 %v1894_v0, %v770_v20 }
 0x1a3   : > { %v843_v24 = vadd.f32 %v1894_v0, %v818_v21 }
 0x1a4   : > { %v1157_v25 = vpack.c.bf16 %v831_v23, %v830_v22 }
 0x1a5   : > { %v1187_v52 = vpack.c.bf16 %v843_v24, %v842_v48 }
 0x1a6   : > { %1189 = vst [vmem:[%s1902_s12 + $0x8] sm:$0xff] %v1157_v25  }
 0x1a7   : > { %1195 = vst [vmem:[%s1902_s12 + $0x38] sm:$0xff] %v1187_v52  }
 0x1a8   : > { %1549 = shalt.err (!%p1546_p6)
}
 0x1a9   : > { %s1550_s26 = scalar_lea.hbm %s1931_s6, 1024  ;;  %s1554_s23 = scalar_lea.hbm %s1983_s4, 2048 }
 0x1aa   : > { %p1551_p8 = scmp.ne.s32.totalorder %s1931_s6, %s1550_s26  ;;  %p1555_p4 = scmp.lt.u32.totalorder %s1931_s6, %s1983_s4 }
 0x1ab   : > { %p1556_p11 = scmp.lt.u32.totalorder %s1554_s23, %s1550_s26  ;;  %p1558_p3 = scmp.lt.u32.totalorder %s1550_s26, %s1931_s6 }
 0x1ac   : > { %p1552_p10 = pnand %p1551_p8, %p1741_p12 }
 0x1ad   : > { %p1557_p13 = por %p1556_p11, %p1555_p4 }
 0x1ae   : > { %p1553_p0 = pneg %p1552_p10 }
 0x1af   : > { %p1559_p7 = por %p1558_p3, %p1557_p13 }
 0x1b1   : > { %p1560_p9 = pnand %p1559_p7, %p1553_p0 }
 0x1b3   : > { %1563 = shalt.err (!%p1560_p9)
}
 0x1b4   : > { %s1620_s21 = smov 64   ;;  %s1621_s14 = smov 4  }
 0x1b5   : > { %1332 = dma.vmem_to_hbm [thread:$0]  (%p1741_p12), %s1933_s10, 1024, %s1931_s6, %s925_s19, %s1620_s21, %s1620_s21, %s1621_s14  }
 0x1b6 PF: > { %s953_s12 = sand.u32 1, %s1598_s15   ;;  %p2006_p1 = scmp.ne.s32.totalorder %s1992_s22, 0 }
 0x1b7   : > { %p2007_p5 = scmp.ge.s32.totalorder %s1610_s18, 2  ;;  %s954_s8 = scalar_lea.sflag [#allocation4], %s953_s12 }
 0x1b9   : > { %p1346_p2 = pnand %p2007_p5, %p2006_p1 }
 0x1bb   : > { %1593 = dma.done.wait (!%p1346_p2), %s954_s8, 1024  }
 0x1bc   : > { %1595 = vsyncadd (!%p1346_p2), %s954_s8, 4294966272  ;;  %p20_p6 = scmp.ge.s32.totalorder %s1703_s27, 4   ;;  %s2008_s15 = smov %s1602_s16 }
 0x1bd   : > { %s2009_s16 = smov %s1606_s17  ;;  %s2010_s17 = smov %s1737_s24 }
 0x1be   : > { %s2011_s18 = smov %s1703_s27  ;;  %22 = sbr.rel (!%p20_p6) target bundleno = 10 (0xa), region = 98 }
 0x1c5   :  { %959 = vsyncpa [#allocation3], 1 }
 0x1c6   :  { %961 = vsyncpa [#allocation3 + $0x1], 1 }
 0x1c7   :  { %962 = vsyncpa [#allocation6], 1 }
 0x1c8   :  { %964 = vsyncpa [#allocation6 + $0x1], 1 }
 0x1c9   :  { %965 = vsyncpa [#allocation4], 1 }
 0x1ca   :  { %967 = vsyncpa [#allocation4 + $0x1], 1 }

</bundles_post_ra>
